<compile_context>
chip_gen: v7x
topology: tpu7x:2x2x1
jax: 0.10.0
libtpu: 0.0.40
codegen_flags: <defaults>
</compile_context>

<pallas_src>
import functools

import jax
import jax.numpy as jnp
import numpy as np
from jax import lax
from jax.experimental import pallas as pl
from jax.experimental.pallas import tpu as pltpu


# ---------------------------------------------------------------------------
# Tiling policy
# ---------------------------------------------------------------------------

def _detect_tile_budget_bytes() -> int:
    """Per-buffer streamed tile budget.

    ~2 MiB keeps tri + 2x(in) + 2x(out) + carry inside the smallest default
    scoped-VMEM limit (16 MiB on v5e).  v6e/v7x default to 32 MiB scoped VMEM
    (and v7x's higher HBM BW makes the ~0.35us/grid-step overhead relatively
    larger), so use ~4 MiB tiles there -- still well under v7x's 64 MiB
    physical VMEM.
    """
    try:
        kind = jax.devices()[0].device_kind.lower()
    except Exception:          # CPU / interpret / unknown backend
        kind = ""
    if "v6" in kind or "v7" in kind:
        return 4 * 1024 * 1024
    return 2 * 1024 * 1024


_TARGET_TILE_BYTES = _detect_tile_budget_bytes()

# f32 matmuls run multi-pass on the bf16 MXU: Lc=256 (64 flop/HBM-byte) keeps
# the lane path memory-bound even on v5e and shrinks the VMEM-resident tri 4x;
# bf16 can afford Lc=512.  Both are multiples of 128 (BlockSpec rule).
_MAX_TRI_EDGE_F32 = 256
_MAX_TRI_EDGE_BF16 = 512
_MAX_INT_CHUNK = 512           # lane-chunk for the integer log-step scan


def _round_up(v: int, m: int) -> int:
    return ((v + m - 1) // m) * m


def _row_tile(R: int, Lc: int, itemsize: int, budget: int) -> int:
    """Second-minor (row) tile for lane-oriented kernels: multiple of 8 or full R."""
    tr = max(8, (budget // max(1, Lc * itemsize)) // 8 * 8)
    if tr >= R:
        # Whole R fits in one tile: split in two when possible so the
        # "parallel" grid axis has >= 2 blocks (keeps both v7x TCs busy).
        if R >= 16:
            half = _round_up(-(-R // 2), 8)
            if half < R:
                return half
        return R
    return tr


def _col_tile(R: int, L: int, itemsize: int, budget: int) -> int:
    """Lane (column) tile for the sublane kernel: multiple of 128 or full R."""
    tc = max(128, (budget // max(1, L * itemsize)) // 128 * 128)
    if tc >= R:
        if R >= 256:
            half = _round_up(-(-R // 2), 128)
            if half < R:
                return half
        return R
    return tc


# ---------------------------------------------------------------------------
# Kernels
# ---------------------------------------------------------------------------

def _cumsum_sublane_mm_kernel(tri_ref, x_ref, o_ref):
    """Cumsum axis on sublanes: out = tril(ones)[L,L] @ x[L,TC]; lane-dense output."""
    x = x_ref[...]
    if x.dtype != tri_ref.dtype:
        x = x.astype(tri_ref.dtype)
    acc = jnp.dot(tri_ref[...], x, preferred_element_type=jnp.float32)
    o_ref[...] = acc.astype(o_ref.dtype)


def _cumsum_lane_mm_kernel(tri_ref, x_ref, o_ref, carry_ref, *, l_total, lc):
    """Cumsum axis on lanes, chunked along L with a running-carry column.

    NOTE: correctness requires the L-chunk grid axis (program_id(1)) to be the
    innermost, sequential ("arbitrary") axis -- the carry scratch persists
    across it and is reset at j == 0.
    """
    j = pl.program_id(1)

    @pl.when(j == 0)
    def _():
        carry_ref[...] = jnp.zeros_like(carry_ref)

    x = x_ref[...]
    if x.dtype != tri_ref.dtype:
        x = x.astype(tri_ref.dtype)
    if l_total % lc != 0:
        # The final partial L-chunk reads undefined padded lanes; 0 * NaN = NaN
        # would poison the matmul accumulation, so zero them explicitly.
        lane = j * lc + lax.broadcasted_iota(jnp.int32, x.shape, x.ndim - 1)
        x = jnp.where(lane < l_total, x, jnp.zeros_like(x))
    part = jnp.dot(x, tri_ref[...], preferred_element_type=jnp.float32)
    part = part + carry_ref[...]               # broadcast (TR,1) over (TR,Lc)
    o_ref[...] = part.astype(o_ref.dtype)
    carry_ref[...] = part[:, -1:]              # running total through this chunk


def _cumsum_int_lane_kernel(x_ref, o_ref, carry_ref, *, lc):
    """Exact integer cumsum along lanes: log-step (Hillis-Steele) scan + carry.

    ceil(log2(Lc)) passes of full-block VPU adds + XLU lane rolls instead of a
    serial per-element scan.  Valid output lanes only ever accumulate lower
    (valid) lanes, so no padding mask is needed for the final partial chunk.
    """
    j = pl.program_id(1)

    @pl.when(j == 0)
    def _():
        carry_ref[...] = jnp.zeros_like(carry_ref)

    x = x_ref[...].astype(carry_ref.dtype)
    lane = lax.broadcasted_iota(jnp.int32, x.shape, x.ndim - 1)
    shift = 1
    while shift < lc:                          # static unroll: ceil(log2(lc)) passes
        rolled = pltpu.roll(x, shift, axis=x.ndim - 1)
        x = x + jnp.where(lane >= shift, rolled, jnp.zeros_like(rolled))
        shift *= 2
    x = x + carry_ref[...]
    o_ref[...] = x.astype(o_ref.dtype)
    carry_ref[...] = x[:, -1:]


# ---------------------------------------------------------------------------
# Wrapper
# ---------------------------------------------------------------------------

@functools.partial(jax.jit, static_argnames=("axis", "reverse", "exclusive"))
def onnx_cumsum(x, axis, reverse=0, exclusive=0):
    if reverse:
        raise NotImplementedError("reverse attribute is not supported (matches PyTorch module)")
    if exclusive:
        raise NotImplementedError("exclusive attribute is not supported (matches PyTorch module)")

    if x.ndim == 0 or x.size == 0:
        return x
    if x.dtype == jnp.bool_:
        x = x.astype(jnp.int32)

    ndim = x.ndim
    axis = axis % ndim
    L = int(x.shape[axis])
    if L == 1:
        return x
    R = int(x.size // L)
    itemsize = int(jnp.dtype(x.dtype).itemsize)
    is_int = jnp.issubdtype(x.dtype, jnp.integer)
    budget = _TARGET_TILE_BYTES

    # ---- float, interior axis, small L: cumsum axis on SUBLANES ------------
    # (a transpose is unavoidable here; putting L on sublanes keeps the output
    #  lane-dense and the streamed DMAs contiguous)
    if (not is_int) and axis != ndim - 1 and L < 128:
        perm = (axis,) + tuple(i for i in range(ndim) if i != axis)
        inv_perm = tuple(int(v) for v in np.argsort(perm))
        xt = jnp.transpose(x, perm)                    # (L, ...)
        x2 = xt.reshape(L, R)

        mm_dtype = jnp.bfloat16 if x.dtype == jnp.bfloat16 else jnp.float32
        TC = _col_tile(R, L, itemsize, budget)
        grid = (pl.cdiv(R, TC),)

        # tri[j, k] = 1 if k <= j   (lower-triangular, inclusive)
        tri = (lax.broadcasted_iota(jnp.int32, (L, L), 1)
               <= lax.broadcasted_iota(jnp.int32, (L, L), 0)).astype(mm_dtype)

        out2 = pl.pallas_call(
            _cumsum_sublane_mm_kernel,
            out_shape=jax.ShapeDtypeStruct((L, R), x.dtype),
            grid_spec=pltpu.PrefetchScalarGridSpec(
                num_scalar_prefetch=0,
                grid=grid,
                in_specs=[pl.BlockSpec((L, L), lambda i: (0, 0)),    # VMEM-resident
                          pl.BlockSpec((L, TC), lambda i: (0, i))],
                out_specs=pl.BlockSpec((L, TC), lambda i: (0, i)),
            ),
            compiler_params=pltpu.CompilerParams(dimension_semantics=("parallel",)),
            cost_estimate=pl.CostEstimate(
                flops=2 * R * L * L, transcendentals=0,
                bytes_accessed=2 * R * L * itemsize
                + L * L * int(jnp.dtype(mm_dtype).itemsize)),
        )(tri, x2)

        out = out2.reshape((L,) + tuple(xt.shape[1:]))
        return jnp.transpose(out, inv_perm)

    # ---- lane-oriented paths: cumsum axis on LANES --------------------------
    # axis == -1 needs no transpose at all (pure reshape); other axes are
    # transposed so the cumsum axis lands on lanes.
    if axis != ndim - 1:
        perm = tuple(i for i in range(ndim) if i != axis) + (axis,)
        inv_perm = tuple(int(v) for v in np.argsort(perm))
        xt = jnp.transpose(x, perm)                    # (..., L)
    else:
        inv_perm = None
        xt = x
    x2 = xt.reshape(R, L)

    if is_int:
        # -------- exact integer cumsum: chunked log-step lane scan ----------
        Lc = L if L <= _MAX_INT_CHUNK else _MAX_INT_CHUNK        # 512 is a mult. of 128
        TR = _row_tile(R, Lc, itemsize, budget)
        grid = (pl.cdiv(R, TR), pl.cdiv(L, Lc))
        carry_dtype = x.dtype if itemsize > 4 else jnp.int32
        n_passes = max(1, (Lc - 1).bit_length())

        out2 = pl.pallas_call(
            functools.partial(_cumsum_int_lane_kernel, lc=Lc),
            out_shape=jax.ShapeDtypeStruct((R, L), x.dtype),
            grid_spec=pltpu.PrefetchScalarGridSpec(
                num_scalar_prefetch=0,
                grid=grid,
                in_specs=[pl.BlockSpec((TR, Lc), lambda i, j: (i, j))],
                out_specs=pl.BlockSpec((TR, Lc), lambda i, j: (i, j)),
                scratch_shapes=[pltpu.VMEM((TR, 1), carry_dtype)],   # running carry
            ),
            # The L-chunk axis (j) MUST stay innermost & sequential: the carry
            # scratch depends on it.
            compiler_params=pltpu.CompilerParams(
                dimension_semantics=("parallel", "arbitrary")),
            cost_estimate=pl.CostEstimate(
                flops=R * L * n_passes, transcendentals=0,
                bytes_accessed=2 * R * L * itemsize),
        )(x2)
    else:
        # -------- float cumsum: chunked matmul-by-triangular-ones -----------
        mm_dtype = jnp.bfloat16 if x.dtype == jnp.bfloat16 else jnp.float32
        max_edge = _MAX_TRI_EDGE_BF16 if mm_dtype == jnp.bfloat16 else _MAX_TRI_EDGE_F32
        Lc = L if L <= max_edge else max_edge                    # mult. of 128 or full L
        TR = _row_tile(R, Lc, itemsize, budget)
        grid = (pl.cdiv(R, TR), pl.cdiv(L, Lc))

        # tri[k, j] = 1 if k <= j   (upper-triangular, inclusive)
        tri = (lax.broadcasted_iota(jnp.int32, (Lc, Lc), 0)
               <= lax.broadcasted_iota(jnp.int32, (Lc, Lc), 1)).astype(mm_dtype)

        out2 = pl.pallas_call(
            functools.partial(_cumsum_lane_mm_kernel, l_total=L, lc=Lc),
            out_shape=jax.ShapeDtypeStruct((R, L), x.dtype),
            grid_spec=pltpu.PrefetchScalarGridSpec(
                num_scalar_prefetch=0,
                grid=grid,
                in_specs=[pl.BlockSpec((Lc, Lc), lambda i, j: (0, 0)),   # VMEM-resident
                          pl.BlockSpec((TR, Lc), lambda i, j: (i, j))],
                out_specs=pl.BlockSpec((TR, Lc), lambda i, j: (i, j)),
                scratch_shapes=[pltpu.VMEM((TR, 1), jnp.float32)],       # running carry
            ),
            # The L-chunk axis (j) MUST stay innermost & sequential (carry).
            compiler_params=pltpu.CompilerParams(
                dimension_semantics=("parallel", "arbitrary")),
            cost_estimate=pl.CostEstimate(
                flops=2 * R * L * Lc, transcendentals=0,
                bytes_accessed=2 * R * L * itemsize
                + Lc * Lc * int(jnp.dtype(mm_dtype).itemsize)),
        )(tri, x2)

    out = out2.reshape(xt.shape)
    if inv_perm is not None:
        out = jnp.transpose(out, inv_perm)
    return out


if __name__ == "__main__":
    key = jax.random.PRNGKey(0)
    k1, k2, k3, k4, k5, k6 = jax.random.split(key, 6)

    # 1) float32, small last-axis cumsum -> lane matmul, NO wrapper transpose
    x1 = jax.random.normal(k1, (2, 4, 16, 16), dtype=jnp.float32)
    out1 = jax.block_until_ready(onnx_cumsum(x1, axis=-1))
    np.testing.assert_allclose(np.asarray(out1),
                               np.asarray(jnp.cumsum(x1, axis=-1)),
                               rtol=1e-5, atol=1e-5)

    # 2) float32, long cumsum axis -> lane-oriented chunked matmul with carry
    x2 = jax.random.normal(k2, (16, 768), dtype=jnp.float32)
    out2 = jax.block_until_ready(onnx_cumsum(x2, axis=1))
    np.testing.assert_allclose(np.asarray(out2),
                               np.asarray(jnp.cumsum(x2, axis=1)),
                               rtol=1e-4, atol=1e-4)

    # 2b) length NOT a multiple of the chunk -> exercises the partial-chunk mask
    x2b = jax.random.normal(k4, (24, 448), dtype=jnp.float32)
    out2b = jax.block_until_ready(onnx_cumsum(x2b, axis=-1))
    np.testing.assert_allclose(np.asarray(out2b),
                               np.asarray(jnp.cumsum(x2b, axis=-1)),
                               rtol=1e-4, atol=1e-4)

    # 3) int32, middle axis -> exact log-step integer scan (transposed to lanes)
    x3 = jax.random.randint(k3, (3, 5, 7), -10, 10, dtype=jnp.int32)
    out3 = jax.block_until_ready(onnx_cumsum(x3, axis=1))
    np.testing.assert_array_equal(np.asarray(out3),
                                  np.asarray(jnp.cumsum(x3, axis=1)))

    # 4) int32, last axis -> log-step integer scan, NO wrapper transpose
    x4 = jax.random.randint(k5, (6, 200), -10, 10, dtype=jnp.int32)
    out4 = jax.block_until_ready(onnx_cumsum(x4, axis=-1))
    np.testing.assert_array_equal(np.asarray(out4),
                                  np.asarray(jnp.cumsum(x4, axis=-1)))

    # 5) float32, interior axis with small L -> sublane matmul (lane-dense out)
    x5 = jax.random.normal(k6, (2, 16, 64), dtype=jnp.float32)
    out5 = jax.block_until_ready(onnx_cumsum(x5, axis=1))
    np.testing.assert_allclose(np.asarray(out5),
                               np.asarray(jnp.cumsum(x5, axis=1)),
                               rtol=1e-5, atol=1e-5)

    print("KERNEL_OK")
</pallas_src>

<mosaic_0001>
module attributes {stable_mosaic.version = 11 : i64} {
  func.func @_cumsum_lane_mm_kernel(%arg0: i32, %arg1: i32, %arg2: memref<16x16xf32, #tpu.memory_space<vmem>>, %arg3: memref<64x16xf32, #tpu.memory_space<vmem>>, %arg4: memref<64x16xf32, #tpu.memory_space<vmem>>, %arg5: memref<64x1xf32, #tpu.memory_space<vmem>>) attributes {dimension_semantics = [#tpu.dimension_semantics<parallel>, #tpu.dimension_semantics<arbitrary>], iteration_bounds = array<i64: 2, 1>, scalar_prefetch = 0 : i64, scratch_operands = 1 : i64, tpu.core_type = #tpu.core_type<tc>, window_params = [{pipeline_mode = #tpu.pipeline_mode<synchronous>, transform_indices = @transform_0, window_bounds = array<i64: 16, 16>}, {transform_indices = @transform_1, window_bounds = array<i64: 64, 16>}, {transform_indices = @transform_2, window_bounds = array<i64: 64, 16>}]} {
    %c0_i32 = arith.constant 0 : i32
    %0 = arith.cmpi eq, %arg1, %c0_i32 : i32
    %1 = arith.extui %0 : i1 to i32
    %c0_i32_0 = arith.constant 0 : i32
    %2 = arith.cmpi ne, %1, %c0_i32_0 : i32
    scf.if %2 {
      %cst_10 = arith.constant 0.000000e+00 : f32
      %12 = vector.broadcast %cst_10 : f32 to vector<64x1xf32>
      %c0_11 = arith.constant 0 : index
      %c0_12 = arith.constant 0 : index
      %13 = vector.load %arg5[%c0_11, %c0_12] : memref<64x1xf32, #tpu.memory_space<vmem>>, vector<64x1xf32>
      tpu.vector_store %arg5[%c0_11, %c0_12], %12 {strides = array<i32>} : memref<64x1xf32, #tpu.memory_space<vmem>>, vector<64x1xf32>,
    } else {
    }
    %c0 = arith.constant 0 : index
    %c0_1 = arith.constant 0 : index
    %3 = vector.load %arg3[%c0, %c0_1] : memref<64x16xf32, #tpu.memory_space<vmem>>, vector<64x16xf32>
    %c0_2 = arith.constant 0 : index
    %c0_3 = arith.constant 0 : index
    %4 = vector.load %arg2[%c0_2, %c0_3] : memref<16x16xf32, #tpu.memory_space<vmem>>, vector<16x16xf32>
    %cst = arith.constant dense<0.000000e+00> : vector<64x16xf32>
    %5 = tpu.matmul %3, %4, %cst {dimension_numbers = #tpu.dot_dimension_numbers<[1], [0], [0], [1], [0, 0, 1, 1], [], []>} : vector<64x16xf32>, vector<16x16xf32>, vector<64x16xf32> -> vector<64x16xf32>
    %c0_4 = arith.constant 0 : index
    %c0_5 = arith.constant 0 : index
    %6 = vector.load %arg5[%c0_4, %c0_5] : memref<64x1xf32, #tpu.memory_space<vmem>>, vector<64x1xf32>
    %7 = vector.broadcast %6 : vector<64x1xf32> to vector<64x16xf32>
    %8 = arith.addf %5, %7 : vector<64x16xf32>
    %c0_6 = arith.constant 0 : index
    %c0_7 = arith.constant 0 : index
    %9 = vector.load %arg4[%c0_6, %c0_7] : memref<64x16xf32, #tpu.memory_space<vmem>>, vector<64x16xf32>
    tpu.vector_store %arg4[%c0_6, %c0_7], %8 {strides = array<i32>} : memref<64x16xf32, #tpu.memory_space<vmem>>, vector<64x16xf32>,
    %10 = vector.extract_strided_slice %8 {offsets = [0, 15], sizes = [64, 1], strides = [1, 1]} : vector<64x16xf32> to vector<64x1xf32>
    %c0_8 = arith.constant 0 : index
    %c0_9 = arith.constant 0 : index
    %11 = vector.load %arg5[%c0_8, %c0_9] : memref<64x1xf32, #tpu.memory_space<vmem>>, vector<64x1xf32>
    tpu.vector_store %arg5[%c0_8, %c0_9], %10 {strides = array<i32>} : memref<64x1xf32, #tpu.memory_space<vmem>>, vector<64x1xf32>,
    return
  }
  func.func @transform_0(%arg0: i32, %arg1: i32) -> (i32, i32) {
    %c0_i32 = arith.constant 0 : i32
    %c0_i32_0 = arith.constant 0 : i32
    %c0_i32_1 = arith.constant 0 : i32
    return %c0_i32, %c0_i32_0 : i32, i32
  }
  func.func @transform_1(%arg0: i32, %arg1: i32) -> (i32, i32) {
    %c0_i32 = arith.constant 0 : i32
    return %arg0, %arg1 : i32, i32
  }
  func.func @transform_2(%arg0: i32, %arg1: i32) -> (i32, i32) {
    %c0_i32 = arith.constant 0 : i32
    return %arg0, %arg1 : i32, i32
  }
}

</mosaic_0001>

<bundles_post_ra>
// kernel: onnx_cumsum.1
= control target key start
LH: loop header
LB: loop body
LE: loop exit
PB: predicated region body
PF: predicated region fallthrough
CT: control target
= control target key end

     0   :  { %7 = vsyncpa [#allocation4], 0  ;;  %s1032_s0 = inlined_call_operand.vmem [shape: f32[16,16], index: 0, kind: input, shape index: {}]   ;;  %s1033_s1 = inlined_call_operand.hbm [shape: f32[128,16], index: 1, kind: input, shape index: {}]   ;;  %s1034_s2 = inlined_call_operand.hbm [shape: f32[128,16], index: 2, kind: output, shape index: {}]  }
   0x1   :  { %9 = vsyncpa [#allocation4 + $0x1], 0 }
   0x2   :  { %10 = vsyncpa [#allocation5], 0 }
   0x3   :  { %12 = vsyncpa [#allocation5 + $0x1], 0  ;;  %s797_s9 = smov 0   ;;  %s799_s10 = smov 0  }
   0x4   :  { %s801_s11 = smov 0   ;;  %s803_s12 = smov 0  }
   0x5   :  { %s805_s13 = smov 0   ;;  %s807_s14 = smov 0  }
   0x6 LB: > { %s531_s15 = sadd.s32 4294967295, %s771_s14   ;;  %s532_s16 = sadd.s32 4294967294, %s771_s14   ;;  %s771_s14 = sphi %s807_s14, %s18_s14   ;;  %s767_s13 = sphi %s805_s13, %s1049_s13   ;;  %s763_s12 = sphi %s803_s12, %s1048_s12   ;;  %s759_s11 = sphi %s801_s11, %s1047_s11   ;;  %s755_s10 = sphi %s799_s10, %s1046_s10   ;;  %s751_s9 = sphi %s797_s9, %s1045_s9  }
   0x7   : > { %s30_s17 = sadd.s32 1, %s767_s13  ;;  %s60_s18 = sadd.s32 1, %s759_s11 }
   0x8   : > { %p32_p0 = scmp.ge.s32.totalorder %s30_s17, 2  ;;  %p67_p1 = scmp.ne.s32.totalorder %s759_s11, %s755_s10 }
   0x9   : > { %p68_p2 = scmp.eq.s32.totalorder %s771_s14, 0  ;;  %p73_p3 = scmp.ne.s32.totalorder %s755_s10, %s751_s9 }
   0xa   : > { %s1051_s17 = smov (%p32_p0, %s30_s17), 0  ;;  %p74_p5 = scmp.eq.s32.totalorder %s531_s15, 0 }
   0xb   : > { %p838_p4 = por %p68_p2, %p67_p1  ;;  %s55_s20 = ssub.s32 %s767_s13, %s1051_s17 }
   0xc   : > { %p99_p6 = scmp.eq.s32.totalorder %s531_s15, 1  ;;  %p58_p7 = scmp.eq.s32.totalorder %s55_s20, 0 }
   0xd   : > { %p844_p8 = por %p74_p5, %p73_p3  ;;  %p105_p10 = scmp.eq.s32.totalorder %s532_s16, 1 }
   0xe   : > { %p848_p9 = por %p99_p6, %p67_p1  ;;  %p600_p13 = scmp.lt.s32.totalorder %s771_s14, 2 }
   0xf   : > { %s853_s23 = scalar_select %p58_p7, %s759_s11, %s60_s18  }
  0x10   : > { %s1038_s22 = scalar_select %p848_p9, 1, 0 }
  0x11   : > { %p855_p11 = por %p105_p10, %p73_p3  ;;  %s128_s25 = sand.u32 1, %s759_s11  }
  0x12   : > { %s535_s26 = sshll.u32 %s128_s25, 6  ;;  %s554_s27 = sshll.u32 %s767_s13, 10 }
  0x13   : > { %s1039_s24 = scalar_select %p855_p11, 1, 0 }
  0x14   : > { %s866_s30 = scalar_lea.hbm %s1033_s1, %s554_s27  ;;  %s132_s3 = scalar_lea.vmem [#allocation3], %s535_s26 }
  0x15   : > { %s140_s4 = sshll.u32 %s132_s3, 4  ;;  %p872_p0 = pnand %p600_p13, %p838_p4  ;;  %s868_s4 = int_to_ptr.vmem [resolvable:$true] %s140_s4 }
  0x16   : > { %s877_s6 = scalar_lea.sflag [#allocation4], %s128_s25  ;;  %s659_s7 = scalar_lea.hbm %s866_s30, 1024 }
  0x17   : > { %p660_p2 = scmp.ne.s32.totalorder %s866_s30, %s659_s7  ;;  %p661_p3 = pneg %p872_p0 }
  0x18   : > { %s664_s16 = scalar_lea.hbm %s1033_s1, 2048  ;;  %p665_p4 = scmp.lt.u32.totalorder %s866_s30, %s1033_s1 }
  0x19   : > { %p662_p5 = pnand %p661_p3, %p660_p2  ;;  %p666_p7 = scmp.lt.u32.totalorder %s664_s16, %s659_s7 }
  0x1a   : > { %p668_p13 = scmp.lt.u32.totalorder %s659_s7, %s866_s30 }
  0x1b   : > { %p663_p6 = pneg %p662_p5  ;;  %p667_p10 = por %p666_p7, %p665_p4 }
  0x1d   : > { %p669_p12 = por %p668_p13, %p667_p10 }
  0x1f   : > { %p670_p1 = pnand %p669_p12, %p663_p6 }
  0x21   : > { %673 = shalt.err (!%p670_p1)
}
  0x22   : > { %s674_s20 = scalar_lea.vmem %s868_s4, 1024  ;;  %s773_s25 = smov [#allocation3]  }
  0x23   : > { %p675_p2 = scmp.ne.s32.totalorder %s868_s4, %s674_s20  ;;  %s679_s26 = sshll.u32 %s773_s25, 4  ;;  %s680_s26 = int_to_ptr.vmem [resolvable:$false] %s679_s26 }
  0x24   : > { %s681_s27 = scalar_lea.vmem %s680_s26, 2048  ;;  %p682_p9 = scmp.lt.s32.totalorder %s868_s4, %s680_s26 }
  0x25   : > { %p677_p5 = pnand %p675_p2, %p661_p3  ;;  %p683_p4 = scmp.lt.s32.totalorder %s681_s27, %s674_s20 }
  0x27   : > { %p678_p11 = pneg %p677_p5  ;;  %p684_p7 = por %p683_p4, %p682_p9 }
  0x29   : > { %p685_p10 = pnand %p684_p7, %p678_p11 }
  0x2b   : > { %688 = shalt.err (!%p685_p10)
}
  0x2c   : > { %s774_s28 = smov 128   ;;  %s775_s29 = smov 8  }
  0x2d   : > { %595 = dma.hbm_to_vmem [thread:$0]  (!%p872_p0), %s866_s30, 1024, %s868_s4, %s877_s6, %s774_s28, %s774_s28, %s775_s29  }
  0x2e   : > { %p148_p12 = scmp.lt.s32.totalorder %s771_s14, 3  ;;  %p1041_p1 = scmp.ge.s32.totalorder %s771_s14, 1 }
  0x30   : > { %p149_p3 = pnand %p1041_p1, %p148_p12 }
  0x31   : > { %s909_s3 = sand.u32 (!%p149_p3), 1, %s755_s10  }
  0x32   : > { %152 = sbr.rel (%p149_p3) target bundleno = 418 (0x1a2), region = 28  ;;  %s539_s7 = sshll.u32 (!%p149_p3), %s909_s3, 6 }
  0x33   : > { %s155_s8 = scalar_lea.sflag (!%p149_p3), [#allocation4], %s909_s3  ;;  %s915_s15 = scalar_lea.vmem (!%p149_p3), [#allocation3], %s539_s7 }
  0x39   : > { %742 = dma.done.wait (%p844_p8), %s155_s8, 1024  }
  0x3a   : > { %744 = vsyncadd (%p844_p8), %s155_s8, 4294966272  ;;  %vm185_vm0 = vcmask 7168   ;;  %v776_v0 = vmov 0   ;;  %v777_v1 = vmov 0.0   ;;  %vm252_vm1 = vcmask 130048   ;;  %v202_v2 = vld [vmem:[%s1032_s0] sm:$0xff] }
  0x3b   : > { %658 = vset.pattern.permute.xlu1 %v776_v0  ;;  %657 = vset.pattern.permute.xlu0 %v776_v0  ;;  %188 = vst.msk [vmem:[#allocation2 + $0x10] sm:$0xff] %vm185_vm0, %v777_v1  ;;  %186 = vst.msk [vmem:[#allocation2] sm:$0xff] %vm185_vm0, %v777_v1  ;;  %v203_v3 = vld [vmem:[%s1032_s0 + $0x8] sm:$0xff]  ;;  %v194_v4 = vld [vmem:[%s915_s15] sm:$0xff]  ;;  %s555_s6 = sshll.u32 %s763_s12, 10  ;;  %s178_s16 = scalar_lea.vmem [#allocation6], %s539_s7 }
  0x3c   : > { %187 = vst.msk [vmem:[#allocation2 + $0x8] sm:$0xff] %vm185_vm0, %v777_v1  ;;  %189 = vst.msk [vmem:[#allocation2 + $0x18] sm:$0xff] %vm185_vm0, %v777_v1  ;;  %v582_v5 = vpack.c.bf16 %v203_v3, %v202_v2  ;;  %570 = vmatprep.mubr.msk.f32.mxu0 %vm252_vm1, %v194_v4  ;;  %v198_v6 = vld [vmem:[%s915_s15 + $0x20] sm:$0xff]  ;;  %v195_v9 = vld [vmem:[%s915_s15 + $0x8] sm:$0xff]  ;;  %s446_s18 = sshll.u32 %s178_s16, 4  ;;  %s778_s19 = smov 113   ;;  %s965_s18 = int_to_ptr.vmem [resolvable:$true] %s446_s18 }
  0x3d   : > { %190 = vst.msk [vmem:[#allocation2 + $0x20] sm:$0xff] %vm185_vm0, %v777_v1  ;;  %191 = vst.msk [vmem:[#allocation2 + $0x28] sm:$0xff] %vm185_vm0, %v777_v1  ;;  %576 = vmatprep.mubr.msk.f32.mxu1 %vm252_vm1, %v198_v6  ;;  %v199_v10 = vld [vmem:[%s915_s15 + $0x28] sm:$0xff]  ;;  %v196_v11 = vld [vmem:[%s915_s15 + $0x10] sm:$0xff]  ;;  %s963_s25 = scalar_lea.hbm %s1034_s2, %s555_s6  ;;  %s432_s26 = scalar_lea.sflag [#allocation5], %s909_s3 }
  0x3e   : > { %192 = vst.msk [vmem:[#allocation2 + $0x30] sm:$0xff] %vm185_vm0, %v777_v1  ;;  %193 = vst.msk [vmem:[#allocation2 + $0x38] sm:$0xff] %vm185_vm0, %v777_v1  ;;  %583 = vmatprep.subr.bf16.mxu0 %v582_v5  ;;  %586 = vmatprep.subr.bf16.mxu1 %v582_v5  ;;  %v200_v12 = vld [vmem:[%s915_s15 + $0x30] sm:$0xff]  ;;  %v197_v15 = vld [vmem:[%s915_s15 + $0x18] sm:$0xff]  ;;  %s689_s27 = scalar_lea.vmem %s965_s18, 1024  ;;  %p1042_p9 = scmp.ne.s32.totalorder %s1038_s22, 0 }
  0x3f   : > { %585 = vmatpush3.bf16.msra.mxu0 %v582_v5  ;;  %587 = vmatpush3.bf16.msra.mxu1 %v582_v5  ;;  %v201_v16 = vld [vmem:[%s915_s15 + $0x38] sm:$0xff]  ;;  %p690_p8 = scmp.ne.s32.totalorder %s965_s18, %s689_s27  ;;  %s779_s28 = smov [#allocation6]  }
  0x40   : > { %s693_s29 = sshll.u32 %s779_s28, 4  ;;  %s694_s29 = int_to_ptr.vmem [resolvable:$false] %s693_s29 }
  0x41   : > { %p691_p11 = pnand %p690_p8, %p1042_p9  ;;  %s695_s7 = scalar_lea.vmem %s694_s29, 2048 }
  0x42   : > { %v206_v7 = vld [vmem:[#allocation2 + $0x10] sm:$0xff]  ;;  %v204_v8 = vld [vmem:[#allocation2] sm:$0xff]  ;;  %571 = vmatmul.mubr.msk.f32.vlgmr.msra.gmra.mrb[0].mxu0 %vm252_vm1, %v195_v9  ;;  %577 = vmatmul.mubr.msk.f32.vlgmr.msra.gmra.mrb[0].mxu1 %vm252_vm1, %v199_v10  ;;  %p696_p6 = scmp.lt.s32.totalorder %s965_s18, %s694_s29  ;;  %p697_p13 = scmp.lt.s32.totalorder %s695_s7, %s689_s27 }
  0x43   : > { %224 = vperm.xlu1 %658, %v206_v7   ;;  %214 = vperm.xlu0 %657, %v204_v8   ;;  %v207_v13 = vld [vmem:[#allocation2 + $0x18] sm:$0xff]  ;;  %v205_v14 = vld [vmem:[#allocation2 + $0x8] sm:$0xff]  ;;  %p692_p0 = pneg %p691_p11 }
  0x44   : > { %573 = vmatprep.mubr.msk.f32.mxu0 %vm252_vm1, %v196_v11  ;;  %579 = vmatprep.mubr.msk.f32.mxu1 %vm252_vm1, %v200_v12  ;;  %v209_v17 = vld [vmem:[#allocation2 + $0x28] sm:$0xff]  ;;  %v208_v18 = vld [vmem:[#allocation2 + $0x20] sm:$0xff]  ;;  %p698_p2 = por %p697_p13, %p696_p6 }
  0x45   : > { %v211_v19 = vld [vmem:[#allocation2 + $0x38] sm:$0xff]  ;;  %v210_v20 = vld [vmem:[#allocation2 + $0x30] sm:$0xff] }
  0x46   : > { %574 = vmatmul.mubr.msk.f32.gmra.mrb[2].mxu0 %vm252_vm1, %v197_v15  ;;  %580 = vmatmul.mubr.msk.f32.gmra.mrb[2].mxu1 %vm252_vm1, %v201_v16  ;;  %p699_p5 = pnand %p698_p2, %p692_p0 }
  0x47   : > { %229 = vperm.xlu1 %658, %v207_v13   ;;  %219 = vperm.xlu0 %657, %v205_v14  }
  0x4b   : > { %239 = vperm.xlu1 %658, %v209_v17   ;;  %234 = vperm.xlu0 %657, %v208_v18  }
  0x4f   : > { %249 = vperm.xlu1 %658, %v211_v19   ;;  %244 = vperm.xlu0 %657, %v210_v20  }
  0xc2   : > { %v225_v21 = vpop.permute.xlu1 %224  ;;  %v215_v22 = vpop.permute.xlu0 %214 }
  0xc6   : > { %v230_v23 = vpop.permute.xlu1 %229  ;;  %v220_v24 = vpop.permute.xlu0 %219 }
  0xca   : > { %v240_v25 = vpop.permute.xlu1 %239  ;;  %v235_v26 = vpop.permute.xlu0 %234 }
  0xce   : > { %v250_v35 = vpop.permute.xlu1 %249  ;;  %v245_v36 = vpop.permute.xlu0 %244 }
 0x115   : > { %v572_v27 = vpop.f32.mrb[0].mxu0  ;;  %v578_v28 = vpop.f32.mrb[0].mxu1 }
 0x116   : > { %v349_v29 = vadd.f32 %v572_v27, %v220_v24  ;;  %v369_v30 = vadd.f32 %v578_v28, %v240_v25  ;;  %v343_v31 = vpop.f32.mrb[1].mxu0  ;;  %v363_v32 = vpop.f32.mrb[1].mxu1 }
 0x117   : > { %v344_v33 = vadd.f32 %v343_v31, %v215_v22  ;;  %v364_v34 = vadd.f32 %v363_v32, %v235_v26 }
 0x118   : > { %383 = vst.msk [vmem:[%s178_s16 + $0x8] sm:$0xff] %vm252_vm1, %v349_v29  ;;  %387 = vst.msk [vmem:[%s178_s16 + $0x28] sm:$0xff] %vm252_vm1, %v369_v30  ;;  %400 = vrot.lane.b32.xlu1 %v349_v29, %s778_s19 }
 0x119   : > { %382 = vst.msk [vmem:[%s178_s16] sm:$0xff] %vm252_vm1, %v344_v33  ;;  %386 = vst.msk [vmem:[%s178_s16 + $0x20] sm:$0xff] %vm252_vm1, %v364_v34  ;;  %v575_v37 = vpop.f32.mrb[2].mxu0  ;;  %v581_v38 = vpop.f32.mrb[2].mxu1  ;;  %398 = vrot.lane.b32.xlu0 %v344_v33, %s778_s19 }
 0x11a   : > { %v359_v39 = vadd.f32 %v575_v37, %v230_v23  ;;  %v379_v40 = vadd.f32 %v581_v38, %v250_v35  ;;  %v353_v41 = vpop.f32.mrb[3].mxu0  ;;  %v373_v42 = vpop.f32.mrb[3].mxu1 }
 0x11b   : > { %v354_v43 = vadd.f32 %v353_v41, %v225_v21  ;;  %v374_v44 = vadd.f32 %v373_v42, %v245_v36 }
 0x11c   : > { %385 = vst.msk [vmem:[%s178_s16 + $0x18] sm:$0xff] %vm252_vm1, %v359_v39  ;;  %389 = vst.msk [vmem:[%s178_s16 + $0x38] sm:$0xff] %vm252_vm1, %v379_v40  ;;  %408 = vrot.lane.b32.xlu1 %v369_v30, %s778_s19 }
 0x11d   : > { %384 = vst.msk [vmem:[%s178_s16 + $0x10] sm:$0xff] %vm252_vm1, %v354_v43  ;;  %388 = vst.msk [vmem:[%s178_s16 + $0x30] sm:$0xff] %vm252_vm1, %v374_v44  ;;  %406 = vrot.lane.b32.xlu0 %v364_v34, %s778_s19 }
 0x11e   : > { %702 = shalt.err (!%p699_p5)
}
 0x11f   : > { %s703_s8 = scalar_lea.hbm %s963_s25, 1024  ;;  %s707_s30 = scalar_lea.hbm %s1034_s2, 2048 }
 0x120   : > { %p704_p4 = scmp.ne.s32.totalorder %s963_s25, %s703_s8  ;;  %p708_p12 = scmp.lt.u32.totalorder %s963_s25, %s1034_s2 }
 0x121   : > { %p709_p1 = scmp.lt.u32.totalorder %s707_s30, %s703_s8  ;;  %p711_p8 = scmp.lt.u32.totalorder %s703_s8, %s963_s25 }
 0x122   : > { %p705_p7 = pnand %p704_p4, %p1042_p9 }
 0x123   : > { %p710_p3 = por %p709_p1, %p708_p12 }
 0x124   : > { %p706_p10 = pneg %p705_p7 }
 0x125   : > { %p712_p11 = por %p711_p8, %p710_p3 }
 0x127   : > { %p713_p0 = pnand %p712_p11, %p706_p10 }
 0x129   : > { %716 = shalt.err (!%p713_p0)
}
 0x12a   : > { %s780_s6 = smov 128   ;;  %s781_s16 = smov 8   ;;  %404 = vrot.lane.b32.xlu1 %v359_v39, %s778_s19  ;;  %402 = vrot.lane.b32.xlu0 %v354_v43, %s778_s19 }
 0x12b   : > { %590 = dma.vmem_to_hbm [thread:$0]  (%p1042_p9), %s965_s18, 1024, %s963_s25, %s432_s26, %s780_s6, %s780_s6, %s781_s16  }
 0x12e   : > { %412 = vrot.lane.b32.xlu1 %v379_v40, %s778_s19  ;;  %410 = vrot.lane.b32.xlu0 %v374_v44, %s778_s19 }
 0x18a   : > { %v401_v45 = vpop.permute.xlu1 %400 }
 0x18b   : > { %424 = vst.msk [vmem:[#allocation2 + $0x8] sm:$0xff] %vm185_vm0, %v401_v45  ;;  %v399_v46 = vpop.permute.xlu0 %398 }
 0x18c   : > { %423 = vst.msk [vmem:[#allocation2] sm:$0xff] %vm185_vm0, %v399_v46 }
 0x18e   : > { %v409_v47 = vpop.permute.xlu1 %408 }
 0x18f   : > { %428 = vst.msk [vmem:[#allocation2 + $0x28] sm:$0xff] %vm185_vm0, %v409_v47  ;;  %v407_v48 = vpop.permute.xlu0 %406 }
 0x190   : > { %427 = vst.msk [vmem:[#allocation2 + $0x20] sm:$0xff] %vm185_vm0, %v407_v48 }
 0x19c   : > { %v405_v49 = vpop.permute.xlu1 %404  ;;  %v403_v50 = vpop.permute.xlu0 %402 }
 0x19d   : > { %426 = vst.msk [vmem:[#allocation2 + $0x18] sm:$0xff] %vm185_vm0, %v405_v49  ;;  %425 = vst.msk [vmem:[#allocation2 + $0x10] sm:$0xff] %vm185_vm0, %v403_v50 }
 0x1a0   : > { %v413_v51 = vpop.permute.xlu1 %412  ;;  %v411_v52 = vpop.permute.xlu0 %410 }
 0x1a1   : > { %430 = vst.msk [vmem:[#allocation2 + $0x38] sm:$0xff] %vm185_vm0, %v413_v51  ;;  %429 = vst.msk [vmem:[#allocation2 + $0x30] sm:$0xff] %vm185_vm0, %v411_v52 }
 0x1a2 PF: > { %s461_s22 = sand.u32 1, %s751_s9   ;;  %p1043_p9 = scmp.ne.s32.totalorder %s1039_s24, 0 }
 0x1a3   : > { %p1044_p6 = scmp.ge.s32.totalorder %s771_s14, 2  ;;  %s462_s3 = scalar_lea.sflag [#allocation5], %s461_s22 }
 0x1a5   : > { %p597_p13 = pnand %p1044_p6, %p1043_p9 }
 0x1a7   : > { %746 = dma.done.wait (!%p597_p13), %s462_s3, 1024  }
 0x1a8   : > { %748 = vsyncadd (!%p597_p13), %s462_s3, 4294966272  ;;  %s18_s14 = sadd.s32 1, %s771_s14   ;;  %s1045_s9 = smov %s755_s10 }
 0x1a9   : > { %p15_p2 = scmp.ge.s32.totalorder %s18_s14, 4   ;;  %s1046_s10 = smov %s759_s11 }
 0x1aa   : > { %s1047_s11 = smov %s853_s23  ;;  %s1048_s12 = smov %s767_s13 }
 0x1ab   : > { %s1049_s13 = smov %s1051_s17  ;;  %17 = sbr.rel (!%p15_p2) target bundleno = 6 (0x6), region = 77 }
 0x1b2   :  { %467 = vsyncpa [#allocation4], 1 }
 0x1b3   :  { %469 = vsyncpa [#allocation4 + $0x1], 1 }
 0x1b4   :  { %470 = vsyncpa [#allocation5], 1 }
 0x1b5   :  { %472 = vsyncpa [#allocation5 + $0x1], 1 }

</bundles_post_ra>
